<compile_context>
chip_gen: v5e
topology: v5e:2x2
jax: 0.10.0
libtpu: 0.0.40
codegen_flags: <defaults>
</compile_context>

<pallas_src>
import numpy as np
import jax
import jax.numpy as jnp
from jax.experimental import pallas as pl
from jax.experimental.pallas import tpu as pltpu

# Finite stand-in for -inf masks: exp() underflows to exactly 0 so masked
# entries get probability 0 (matching torch semantics) without 0*inf NaNs.
NEG = -1e30
LANES = 128                      # lane-dense aux / output width
MXU_DTYPE = jnp.bfloat16         # matmul operand dtype (f32 accumulation)


# --------------------------------------------------------------------------
# Fused per-batch-element ActorNet kernel (both stages + sampling)
# --------------------------------------------------------------------------
def _actor_kernel(x1_ref, x2t_ref, aux_ref, wmx_ref, wvec_ref, out_ref):
    # x1_ref : (N1p, 2F) f32   augmented graph-1 features, right half zero
    # x2t_ref: (2F, N2p) bf16  augmented graph-2 features, transposed, top half zero
    # aux_ref: (4, 128)  f32   rows: u1 | u2 | mask1(+b3) | mask2 base
    # wmx_ref: (4F, 2F)  bf16  rows [0:2F]=[W1|Wq ; 0], rows [2F:4F]=[W2|0 ; 0]
    # wvec_ref: (3, 2F)  f32   rows: [b1|0], [b2|0], [w3|0]
    # out_ref: (1, 128)  f32   lanes: act1, act2, logp1, logp2, entropy
    N1p, F2 = x1_ref.shape
    N2p = x2t_ref.shape[1]
    N1, N2 = N1p - 1, N2p - 1

    x1 = x1_ref[...]                                   # (N1p, 2F) f32
    x1b = x1.astype(MXU_DTYPE)

    w1q = wmx_ref[0:F2, :]                             # (2F, 2F) bf16
    w2p = wmx_ref[F2:2 * F2, :]                        # (2F, 2F) bf16
    wv = wvec_ref[...]                                 # (3, 2F) f32
    b1 = wv[0:1, :]
    b2 = wv[1:2, :]
    w3 = wv[2:3, :]

    # ---- fused stage-1 MLP + query projection: one MXU pass over x1 --------
    h_all = jnp.dot(x1b, w1q, preferred_element_type=jnp.float32)     # (N1p, 2F)
    h1 = jnp.maximum(h_all + b1, 0.0)
    # w2p rows [F:2F] are zero -> the query half of h1 is ignored; its right
    # output half stays exactly 0 so the f32 residual add stays clean.
    h2 = jnp.maximum(
        jnp.dot(h1.astype(MXU_DTYPE), w2p, preferred_element_type=jnp.float32)
        + b2 + x1, 0.0)                                                # (N1p, 2F)
    # (1,2F) x (N1p,2F)^T -> per-node stage-1 score row (f32 head).
    s1 = jax.lax.dot_general(w3, h2, (((1,), (1,)), ((), ())),
                             preferred_element_type=jnp.float32)       # (1, N1p)

    u1 = aux_ref[0:1, 0:N1p]
    u2 = aux_ref[1:2, 0:N2p]
    mask1 = aux_ref[2:3, 0:N1p]                        # b3 already folded in
    mask2b = aux_ref[3:4, 0:N2p]

    ids1 = jax.lax.broadcasted_iota(jnp.int32, (1, N1p), 1)
    ids2 = jax.lax.broadcasted_iota(jnp.int32, (1, N2p), 1)

    def masked_stats(scores, mask):
        logits = scores + mask                         # f32 epilogue
        m = jnp.max(logits, axis=1, keepdims=True)
        e = jnp.exp(logits - m)
        d = jnp.sum(e, axis=1, keepdims=True)
        logp = logits - m - jnp.log(d)
        probs = jnp.exp(logp)                          # exact; no approx divide
        ent = -jnp.sum(probs * logp, axis=1, keepdims=True)
        return logp, ent

    def gumbel_argmax(logp, u, ids):
        # Categorical sample via Gumbel-max over pre-sampled uniforms.
        g = -jnp.log(-jnp.log(u))
        z = logp + g
        zmax = jnp.max(z, axis=1, keepdims=True)
        cand = jnp.where(z >= zmax, ids.astype(jnp.float32), 1e9)
        actf = jnp.min(cand, axis=1, keepdims=True)    # lowest index among maxima
        acti = actf.astype(jnp.int32)
        lp = jnp.sum(jnp.where(ids == acti, logp, 0.0), axis=1, keepdims=True)
        return actf, acti, lp

    logp1, ent1 = masked_stats(s1, mask1)
    act1f, act1i, lp1 = gumbel_argmax(logp1, u1, ids1)

    # ---- stage-2 mask: real columns precomputed, dummy column needs act1 ----
    mask2 = jnp.where(ids2 == N2,
                      jnp.where(act1i == N1, NEG, 0.0),
                      mask2b)
    # NOTE: if act1 hits the dummy node while every real column already has
    # col-sum == 1, mask2 is all-NEG (same degenerate case as the torch code).

    # ---- stage-2 scores: one-hot row select from h_all, tanh, tiny MXU dot --
    rown = jax.lax.broadcasted_iota(jnp.int32, (N1p, F2), 0)
    qprev = jnp.tanh(jnp.sum(jnp.where(rown == act1i, h_all, 0.0),
                             axis=0, keepdims=True))                   # (1, 2F)
    # x2t rows [0:F] are zero -> the stage-1 half of qprev is annihilated.
    s2 = jnp.dot(qprev.astype(MXU_DTYPE), x2t_ref[...],
                 preferred_element_type=jnp.float32)                   # (1, N2p)

    logp2, ent2 = masked_stats(s2, mask2)
    act2f, act2i, lp2 = gumbel_argmax(logp2, u2, ids2)

    # ---- single lane-dense packed output (full-width unmasked store) --------
    lane = jax.lax.broadcasted_iota(jnp.int32, out_ref.shape, 1)
    out_ref[...] = jnp.where(lane == 0, act1f,
                   jnp.where(lane == 1, act2f,
                   jnp.where(lane == 2, lp1,
                   jnp.where(lane == 3, lp2,
                   jnp.where(lane == 4, ent1 + ent2, 0.0)))))


# --------------------------------------------------------------------------
# Wrapper
# --------------------------------------------------------------------------
def actor_forward(params, input_feat1, input_feat2, partial_x, key):
    """Fused ActorNet._act: returns (acts (2,B), log_probs (2,B), entropy (B,))."""
    B, N1, F = input_feat1.shape
    _, N2, _ = input_feat2.shape
    N1p, N2p = N1 + 1, N2 + 1
    F2 = 2 * F
    assert partial_x.shape == (B, N1p, N2p)
    assert N1p <= LANES and N2p <= LANES
    f32 = jnp.float32

    # ---- feature augmentation (tiny wrapper-side XLA ops) -------------------
    x1a = jnp.concatenate(
        [input_feat1, jnp.max(input_feat1, axis=1, keepdims=True)], axis=1)
    x2a = jnp.concatenate(
        [input_feat2, jnp.max(input_feat2, axis=1, keepdims=True)], axis=1)
    # x1 padded to 2F lanes (right half zero) so every kernel matmul is full width.
    x1p = jnp.concatenate([x1a, jnp.zeros_like(x1a)], axis=2).astype(f32)
    # stage-2 RHS: (B, 2F, N2p) bf16; zero top half kills the stage-1 lanes of qprev.
    x2t = jnp.concatenate([jnp.zeros((B, F, N2p), f32),
                           jnp.transpose(x2a, (0, 2, 1))], axis=1).astype(MXU_DTYPE)

    # ---- masks from the padded partial assignment matrix --------------------
    px = partial_x.astype(f32)
    rowsum = jnp.sum(px, axis=2)                       # (B, N1p)
    colsum = jnp.sum(px, axis=1)                       # (B, N2p)
    ids1 = jnp.arange(N1p)[None, :]
    b3 = params["b3"].astype(f32).reshape(())          # folded into mask1 (shift-invariant)
    mask1 = jnp.where((rowsum != 1.0) | (ids1 == N1), b3, NEG)
    mask2b = jnp.where(colsum != 1.0, 0.0, NEG)        # dummy column handled in-kernel

    # ---- pre-sampled uniforms (single RNG launch) ----------------------------
    u = jax.random.uniform(key, (B, 2, LANES), f32, 1e-6, 1.0 - 1e-6)

    def lane_pad(a):
        return jnp.pad(a, ((0, 0), (0, LANES - a.shape[1])), constant_values=NEG)

    aux = jnp.concatenate([u, lane_pad(mask1)[:, None, :],
                           lane_pad(mask2b)[:, None, :]], axis=1)      # (B, 4, 128)

    # ---- packed weight slabs -------------------------------------------------
    W1, Wq, W2 = params["w1"], params["wq"], params["w2"]
    zF2 = jnp.zeros((F, F2), f32)
    w1q = jnp.concatenate([jnp.concatenate([W1, Wq], axis=1), zF2], axis=0)   # (2F,2F)
    w2p = jnp.concatenate([jnp.concatenate([W2, jnp.zeros((F, F), f32)], axis=1),
                           zF2], axis=0)                                      # (2F,2F)
    wmx = jnp.concatenate([w1q, w2p], axis=0).astype(MXU_DTYPE)               # (4F,2F)

    def vrow(v):
        return jnp.concatenate([v.reshape(1, F).astype(f32),
                                jnp.zeros((1, F), f32)], axis=1)
    wvec = jnp.concatenate([vrow(params["b1"]), vrow(params["b2"]),
                            vrow(params["w3"])], axis=0)                       # (3, 2F)

    stats = pl.pallas_call(
        _actor_kernel,
        out_shape=jax.ShapeDtypeStruct((B, 1, LANES), f32),
        grid=(B,),
        in_specs=[
            pl.BlockSpec((None, N1p, F2), lambda b: (b, 0, 0)),
            pl.BlockSpec((None, F2, N2p), lambda b: (b, 0, 0)),
            pl.BlockSpec((None, 4, LANES), lambda b: (b, 0, 0)),
            pl.BlockSpec((4 * F, F2), lambda b: (0, 0)),    # weights stay resident
            pl.BlockSpec((3, F2), lambda b: (0, 0)),
        ],
        out_specs=pl.BlockSpec((None, 1, LANES), lambda b: (b, 0, 0)),
        compiler_params=pltpu.CompilerParams(dimension_semantics=("parallel",)),
    )(x1p, x2t, aux, wmx, wvec)

    stats = stats[:, 0, :]
    act1 = stats[:, 0].astype(jnp.int32)
    act2 = stats[:, 1].astype(jnp.int32)
    return (jnp.stack([act1, act2]),
            jnp.stack([stats[:, 2], stats[:, 3]]),
            stats[:, 4])


# --------------------------------------------------------------------------
# Pure-JAX reference mirroring the kernel math (same MXU operand casts)
# --------------------------------------------------------------------------
def ref_forward(params, input_feat1, input_feat2, partial_x, u1, u2):
    B, N1, F = input_feat1.shape
    _, N2, _ = input_feat2.shape
    N1p, N2p = N1 + 1, N2 + 1
    x1 = jnp.concatenate([input_feat1, jnp.max(input_feat1, axis=1, keepdims=True)], axis=1)
    x2 = jnp.concatenate([input_feat2, jnp.max(input_feat2, axis=1, keepdims=True)], axis=1)

    rowsum = jnp.sum(partial_x, axis=-1)
    ids1 = jnp.arange(N1p)[None, :]
    mask1 = jnp.where((rowsum != 1.0) | (ids1 == N1), 0.0, NEG)

    x1b = x1.astype(MXU_DTYPE)
    h1 = jnp.maximum(jnp.einsum('bnf,fg->bng', x1b, params["w1"].astype(MXU_DTYPE),
                                preferred_element_type=jnp.float32) + params["b1"], 0.0)
    h2 = jnp.maximum(jnp.einsum('bnf,fg->bng', h1.astype(MXU_DTYPE),
                                params["w2"].astype(MXU_DTYPE),
                                preferred_element_type=jnp.float32)
                     + params["b2"] + x1, 0.0)
    s1 = jnp.sum(h2 * params["w3"].reshape(F), axis=-1) + params["b3"]

    logp1 = jax.nn.log_softmax(s1 + mask1, axis=1)
    ent1 = -jnp.sum(jnp.exp(logp1) * logp1, axis=1)
    g1 = -jnp.log(-jnp.log(u1))
    act1 = jnp.argmax(logp1 + g1, axis=1).astype(jnp.int32)
    lp1 = jnp.take_along_axis(logp1, act1[:, None], axis=1)[:, 0]

    colsum = jnp.sum(partial_x, axis=1)
    ids2 = jnp.arange(N2p)[None, :]
    avail2 = jnp.where(ids2 == N2, (act1 != N1)[:, None], colsum != 1.0)
    mask2 = jnp.where(avail2, 0.0, NEG)

    qpre = jnp.einsum('bnf,fg->bng', x1b, params["wq"].astype(MXU_DTYPE),
                      preferred_element_type=jnp.float32)
    qprev = jnp.tanh(jnp.take_along_axis(qpre, act1[:, None, None], axis=1)[:, 0, :])
    s2 = jnp.einsum('bf,bjf->bj', qprev.astype(MXU_DTYPE), x2.astype(MXU_DTYPE),
                    preferred_element_type=jnp.float32)

    logp2 = jax.nn.log_softmax(s2 + mask2, axis=1)
    ent2 = -jnp.sum(jnp.exp(logp2) * logp2, axis=1)
    g2 = -jnp.log(-jnp.log(u2))
    act2 = jnp.argmax(logp2 + g2, axis=1).astype(jnp.int32)
    lp2 = jnp.take_along_axis(logp2, act2[:, None], axis=1)[:, 0]

    return (jnp.stack([act1, act2]), jnp.stack([lp1, lp2]), ent1 + ent2)


# --------------------------------------------------------------------------
def init_params(key, F):
    ks = jax.random.split(key, 6)
    scale = 1.0 / np.sqrt(F)
    return dict(
        w1=jax.random.normal(ks[0], (F, F), jnp.float32) * scale,
        b1=jax.random.normal(ks[1], (F,), jnp.float32) * scale,
        w2=jax.random.normal(ks[2], (F, F), jnp.float32) * scale,
        b2=jax.random.normal(ks[3], (F,), jnp.float32) * scale,
        w3=jax.random.normal(ks[4], (1, F), jnp.float32) * scale,
        b3=jnp.zeros((1,), jnp.float32),
        wq=jax.random.normal(ks[5], (F, F), jnp.float32) * scale,
    )


if __name__ == "__main__":
    B, F = 2, 32            # state_feature_size = 32
    N1, N2 = 8, 10          # graph-1 / graph-2 node counts (before dummy node)
    N1p, N2p = N1 + 1, N2 + 1

    root = jax.random.PRNGKey(0)
    k_param, k_f1, k_f2, k_sample = jax.random.split(root, 4)

    params = init_params(k_param, F)
    input_feat1 = jax.random.normal(k_f1, (B, N1, F), jnp.float32)
    input_feat2 = jax.random.normal(k_f2, (B, N2, F), jnp.float32)

    # padded partial assignment matrices (a few nodes already matched)
    px = np.zeros((B, N1p, N2p), dtype=np.float32)
    px[0, 0, 0] = 1.0
    px[0, 1, 2] = 1.0
    px[1, 3, 1] = 1.0
    partial_x = jnp.asarray(px)

    fwd = jax.jit(actor_forward)
    acts, log_probs, entropy = fwd(params, input_feat1, input_feat2,
                                   partial_x, k_sample)
    jax.block_until_ready((acts, log_probs, entropy))

    # ---- spot-check against the pure-JAX reference using the SAME uniforms ----
    u = jax.random.uniform(k_sample, (B, 2, LANES), jnp.float32, 1e-6, 1.0 - 1e-6)
    u1 = u[:, 0, :N1p]
    u2 = u[:, 1, :N2p]
    acts_r, log_probs_r, entropy_r = ref_forward(
        params, input_feat1, input_feat2, partial_x, u1, u2)

    np.testing.assert_array_equal(np.asarray(acts), np.asarray(acts_r))
    np.testing.assert_allclose(np.asarray(log_probs), np.asarray(log_probs_r),
                               rtol=1e-2, atol=1e-2)
    np.testing.assert_allclose(np.asarray(entropy), np.asarray(entropy_r),
                               rtol=1e-2, atol=1e-2)

    assert acts.shape == (2, B)
    assert log_probs.shape == (2, B)
    assert entropy.shape == (B,)
    print("KERNEL_OK")
</pallas_src>

<mosaic_0001>
module attributes {stable_mosaic.version = 11 : i64} {
  func.func @_actor_kernel(%arg0: i32, %arg1: memref<1x9x64xf32, #tpu.memory_space<vmem>>, %arg2: memref<1x64x11xbf16, #tpu.memory_space<vmem>>, %arg3: memref<1x4x128xf32, #tpu.memory_space<vmem>>, %arg4: memref<128x64xbf16, #tpu.memory_space<vmem>>, %arg5: memref<3x64xf32, #tpu.memory_space<vmem>>, %arg6: memref<1x1x128xf32, #tpu.memory_space<vmem>>) attributes {dimension_semantics = [#tpu.dimension_semantics<parallel>], iteration_bounds = array<i64: 2>, scalar_prefetch = 0 : i64, scratch_operands = 0 : i64, tpu.core_type = #tpu.core_type<tc>, window_params = [{transform_indices = @transform_0, window_bounds = array<i64: 1, 9, 64>}, {transform_indices = @transform_1, window_bounds = array<i64: 1, 64, 11>}, {transform_indices = @transform_2, window_bounds = array<i64: 1, 4, 128>}, {pipeline_mode = #tpu.pipeline_mode<synchronous>, transform_indices = @transform_3, window_bounds = array<i64: 128, 64>}, {pipeline_mode = #tpu.pipeline_mode<synchronous>, transform_indices = @transform_4, window_bounds = array<i64: 3, 64>}, {transform_indices = @transform_5, window_bounds = array<i64: 1, 1, 128>}]} {
    %c0 = arith.constant 0 : index
    %c0_0 = arith.constant 0 : index
    %c0_1 = arith.constant 0 : index
    %0 = vector.load %arg1[%c0, %c0_0, %c0_1] : memref<1x9x64xf32, #tpu.memory_space<vmem>>, vector<1x9x64xf32>
    %1 = vector.shape_cast %0 : vector<1x9x64xf32> to vector<9x64xf32>
    %2 = arith.truncf %1 : vector<9x64xf32> to vector<9x64xbf16>
    %c0_2 = arith.constant 0 : index
    %c0_3 = arith.constant 0 : index
    %3 = vector.load %arg4[%c0_2, %c0_3] : memref<128x64xbf16, #tpu.memory_space<vmem>>, vector<64x64xbf16>
    %c64 = arith.constant 64 : index
    %c0_4 = arith.constant 0 : index
    %4 = vector.load %arg4[%c64, %c0_4] : memref<128x64xbf16, #tpu.memory_space<vmem>>, vector<64x64xbf16>
    %c0_5 = arith.constant 0 : index
    %c0_6 = arith.constant 0 : index
    %5 = vector.load %arg5[%c0_5, %c0_6] : memref<3x64xf32, #tpu.memory_space<vmem>>, vector<3x64xf32>
    %6 = vector.extract_strided_slice %5 {offsets = [0, 0], sizes = [1, 64], strides = [1, 1]} : vector<3x64xf32> to vector<1x64xf32>
    %7 = vector.extract_strided_slice %5 {offsets = [1, 0], sizes = [1, 64], strides = [1, 1]} : vector<3x64xf32> to vector<1x64xf32>
    %8 = vector.extract_strided_slice %5 {offsets = [2, 0], sizes = [1, 64], strides = [1, 1]} : vector<3x64xf32> to vector<1x64xf32>
    %cst = arith.constant dense<0.000000e+00> : vector<9x64xf32>
    %9 = tpu.matmul %2, %3, %cst {dimension_numbers = #tpu.dot_dimension_numbers<[1], [0], [0], [1], [0, 0, 1, 1], [], []>} : vector<9x64xbf16>, vector<64x64xbf16>, vector<9x64xf32> -> vector<9x64xf32>
    %10 = vector.broadcast %6 : vector<1x64xf32> to vector<9x64xf32>
    %11 = arith.addf %9, %10 : vector<9x64xf32>
    %cst_7 = arith.constant 0.000000e+00 : f32
    %12 = vector.broadcast %cst_7 : f32 to vector<9x64xf32>
    %13 = arith.maximumf %11, %12 : vector<9x64xf32>
    %14 = arith.truncf %13 : vector<9x64xf32> to vector<9x64xbf16>
    %cst_8 = arith.constant dense<0.000000e+00> : vector<9x64xf32>
    %15 = tpu.matmul %14, %4, %cst_8 {dimension_numbers = #tpu.dot_dimension_numbers<[1], [0], [0], [1], [0, 0, 1, 1], [], []>} : vector<9x64xbf16>, vector<64x64xbf16>, vector<9x64xf32> -> vector<9x64xf32>
    %16 = vector.broadcast %7 : vector<1x64xf32> to vector<9x64xf32>
    %17 = arith.addf %15, %16 : vector<9x64xf32>
    %18 = arith.addf %17, %1 : vector<9x64xf32>
    %cst_9 = arith.constant 0.000000e+00 : f32
    %19 = vector.broadcast %cst_9 : f32 to vector<9x64xf32>
    %20 = arith.maximumf %18, %19 : vector<9x64xf32>
    %cst_10 = arith.constant dense<0.000000e+00> : vector<1x9xf32>
    %21 = tpu.matmul %8, %20, %cst_10 {dimension_numbers = #tpu.dot_dimension_numbers<[1], [1], [0], [0], [0, 0, 1, 0], [], []>} : vector<1x64xf32>, vector<9x64xf32>, vector<1x9xf32> -> vector<1x9xf32>
    %c0_11 = arith.constant 0 : index
    %c0_12 = arith.constant 0 : index
    %c0_13 = arith.constant 0 : index
    %22 = vector.load %arg3[%c0_11, %c0_12, %c0_13] : memref<1x4x128xf32, #tpu.memory_space<vmem>>, vector<1x1x9xf32>
    %23 = vector.shape_cast %22 : vector<1x1x9xf32> to vector<1x9xf32>
    %c0_14 = arith.constant 0 : index
    %c1 = arith.constant 1 : index
    %c0_15 = arith.constant 0 : index
    %24 = vector.load %arg3[%c0_14, %c1, %c0_15] : memref<1x4x128xf32, #tpu.memory_space<vmem>>, vector<1x1x11xf32>
    %25 = vector.shape_cast %24 : vector<1x1x11xf32> to vector<1x11xf32>
    %c0_16 = arith.constant 0 : index
    %c2 = arith.constant 2 : index
    %c0_17 = arith.constant 0 : index
    %26 = vector.load %arg3[%c0_16, %c2, %c0_17] : memref<1x4x128xf32, #tpu.memory_space<vmem>>, vector<1x1x9xf32>
    %27 = vector.shape_cast %26 : vector<1x1x9xf32> to vector<1x9xf32>
    %c0_18 = arith.constant 0 : index
    %c3 = arith.constant 3 : index
    %c0_19 = arith.constant 0 : index
    %28 = vector.load %arg3[%c0_18, %c3, %c0_19] : memref<1x4x128xf32, #tpu.memory_space<vmem>>, vector<1x1x11xf32>
    %29 = vector.shape_cast %28 : vector<1x1x11xf32> to vector<1x11xf32>
    %30 = tpu.iota {dimensions = array<i32: 1>} : vector<1x9xi32>
    %31 = tpu.iota {dimensions = array<i32: 1>} : vector<1x11xi32>
    %32 = arith.addf %21, %27 : vector<1x9xf32>
    %cst_20 = arith.constant dense<0xFF800000> : vector<1xf32>
    %33 = vector.multi_reduction <maximumf>, %32, %cst_20 [1] : vector<1x9xf32> to vector<1xf32>
    %34 = vector.shape_cast %33 : vector<1xf32> to vector<1x1xf32>
    %35 = vector.broadcast %34 : vector<1x1xf32> to vector<1x9xf32>
    %36 = arith.subf %32, %35 : vector<1x9xf32>
    %37 = math.exp %36 : vector<1x9xf32>
    %cst_21 = arith.constant dense<0.000000e+00> : vector<1xf32>
    %38 = vector.multi_reduction <add>, %37, %cst_21 [1] : vector<1x9xf32> to vector<1xf32>
    %39 = vector.shape_cast %38 : vector<1xf32> to vector<1x1xf32>
    %40 = vector.broadcast %34 : vector<1x1xf32> to vector<1x9xf32>
    %41 = arith.subf %32, %40 : vector<1x9xf32>
    %42 = math.log %39 : vector<1x1xf32>
    %43 = vector.broadcast %42 : vector<1x1xf32> to vector<1x9xf32>
    %44 = arith.subf %41, %43 : vector<1x9xf32>
    %45 = math.exp %44 : vector<1x9xf32>
    %46 = arith.mulf %45, %44 : vector<1x9xf32>
    %cst_22 = arith.constant dense<0.000000e+00> : vector<1xf32>
    %47 = vector.multi_reduction <add>, %46, %cst_22 [1] : vector<1x9xf32> to vector<1xf32>
    %48 = vector.shape_cast %47 : vector<1xf32> to vector<1x1xf32>
    %cst_23 = arith.constant 0.000000e+00 : f32
    %49 = vector.broadcast %cst_23 : f32 to vector<1x1xf32>
    %50 = arith.subf %49, %48 : vector<1x1xf32>
    %51 = math.log %23 : vector<1x9xf32>
    %cst_24 = arith.constant 0.000000e+00 : f32
    %52 = vector.broadcast %cst_24 : f32 to vector<1x9xf32>
    %53 = arith.subf %52, %51 : vector<1x9xf32>
    %54 = math.log %53 : vector<1x9xf32>
    %cst_25 = arith.constant 0.000000e+00 : f32
    %55 = vector.broadcast %cst_25 : f32 to vector<1x9xf32>
    %56 = arith.subf %55, %54 : vector<1x9xf32>
    %57 = arith.addf %44, %56 : vector<1x9xf32>
    %cst_26 = arith.constant dense<0xFF800000> : vector<1xf32>
    %58 = vector.multi_reduction <maximumf>, %57, %cst_26 [1] : vector<1x9xf32> to vector<1xf32>
    %59 = vector.shape_cast %58 : vector<1xf32> to vector<1x1xf32>
    %60 = vector.broadcast %59 : vector<1x1xf32> to vector<1x9xf32>
    %61 = arith.cmpf oge, %57, %60 : vector<1x9xf32>
    %62 = arith.sitofp %30 : vector<1x9xi32> to vector<1x9xf32>
    %cst_27 = arith.constant 1.000000e+09 : f32
    %63 = vector.broadcast %cst_27 : f32 to vector<1x9xf32>
    %64 = arith.select %61, %62, %63 : vector<1x9xi1>, vector<1x9xf32>
    %cst_28 = arith.constant dense<0x7F800000> : vector<1xf32>
    %65 = vector.multi_reduction <minimumf>, %64, %cst_28 [1] : vector<1x9xf32> to vector<1xf32>
    %66 = vector.shape_cast %65 : vector<1xf32> to vector<1x1xf32>
    %67 = arith.fptosi %66 : vector<1x1xf32> to vector<1x1xi32>
    %68 = vector.broadcast %67 : vector<1x1xi32> to vector<1x9xi32>
    %69 = arith.cmpi eq, %30, %68 : vector<1x9xi32>
    %cst_29 = arith.constant 0.000000e+00 : f32
    %70 = vector.broadcast %cst_29 : f32 to vector<1x9xf32>
    %71 = arith.select %69, %44, %70 : vector<1x9xi1>, vector<1x9xf32>
    %cst_30 = arith.constant dense<0.000000e+00> : vector<1xf32>
    %72 = vector.multi_reduction <add>, %71, %cst_30 [1] : vector<1x9xf32> to vector<1xf32>
    %73 = vector.shape_cast %72 : vector<1xf32> to vector<1x1xf32>
    %c10_i32 = arith.constant 10 : i32
    %74 = vector.broadcast %c10_i32 : i32 to vector<1x11xi32>
    %75 = arith.cmpi eq, %31, %74 : vector<1x11xi32>
    %c8_i32 = arith.constant 8 : i32
    %76 = vector.broadcast %c8_i32 : i32 to vector<1x1xi32>
    %77 = arith.cmpi eq, %67, %76 : vector<1x1xi32>
    %cst_31 = arith.constant -1.000000e+30 : f32
    %cst_32 = arith.constant 0.000000e+00 : f32
    %78 = vector.broadcast %cst_31 : f32 to vector<1x1xf32>
    %79 = vector.broadcast %cst_32 : f32 to vector<1x1xf32>
    %80 = arith.select %77, %78, %79 : vector<1x1xi1>, vector<1x1xf32>
    %81 = vector.shape_cast %80 : vector<1x1xf32> to vector<1x1xf32>
    %82 = vector.broadcast %81 : vector<1x1xf32> to vector<1x11xf32>
    %83 = arith.select %75, %82, %29 : vector<1x11xi1>, vector<1x11xf32>
    %84 = tpu.iota {dimensions = array<i32: 0>} : vector<9x64xi32>
    %85 = vector.broadcast %67 : vector<1x1xi32> to vector<9x64xi32>
    %86 = arith.cmpi eq, %84, %85 : vector<9x64xi32>
    %cst_33 = arith.constant 0.000000e+00 : f32
    %87 = vector.broadcast %cst_33 : f32 to vector<9x64xf32>
    %88 = arith.select %86, %9, %87 : vector<9x64xi1>, vector<9x64xf32>
    %cst_34 = arith.constant dense<0.000000e+00> : vector<64xf32>
    %89 = vector.multi_reduction <add>, %88, %cst_34 [0] : vector<9x64xf32> to vector<64xf32>
    %90 = vector.shape_cast %89 : vector<64xf32> to vector<1x64xf32>
    %91 = math.tanh %90 : vector<1x64xf32>
    %92 = arith.truncf %91 : vector<1x64xf32> to vector<1x64xbf16>
    %c0_35 = arith.constant 0 : index
    %c0_36 = arith.constant 0 : index
    %c0_37 = arith.constant 0 : index
    %93 = vector.load %arg2[%c0_35, %c0_36, %c0_37] : memref<1x64x11xbf16, #tpu.memory_space<vmem>>, vector<1x64x11xbf16>
    %94 = vector.shape_cast %93 : vector<1x64x11xbf16> to vector<64x11xbf16>
    %cst_38 = arith.constant dense<0.000000e+00> : vector<1x11xf32>
    %95 = tpu.matmul %92, %94, %cst_38 {dimension_numbers = #tpu.dot_dimension_numbers<[1], [0], [0], [1], [0, 0, 1, 1], [], []>} : vector<1x64xbf16>, vector<64x11xbf16>, vector<1x11xf32> -> vector<1x11xf32>
    %96 = arith.addf %95, %83 : vector<1x11xf32>
    %cst_39 = arith.constant dense<0xFF800000> : vector<1xf32>
    %97 = vector.multi_reduction <maximumf>, %96, %cst_39 [1] : vector<1x11xf32> to vector<1xf32>
    %98 = vector.shape_cast %97 : vector<1xf32> to vector<1x1xf32>
    %99 = vector.broadcast %98 : vector<1x1xf32> to vector<1x11xf32>
    %100 = arith.subf %96, %99 : vector<1x11xf32>
    %101 = math.exp %100 : vector<1x11xf32>
    %cst_40 = arith.constant dense<0.000000e+00> : vector<1xf32>
    %102 = vector.multi_reduction <add>, %101, %cst_40 [1] : vector<1x11xf32> to vector<1xf32>
    %103 = vector.shape_cast %102 : vector<1xf32> to vector<1x1xf32>
    %104 = vector.broadcast %98 : vector<1x1xf32> to vector<1x11xf32>
    %105 = arith.subf %96, %104 : vector<1x11xf32>
    %106 = math.log %103 : vector<1x1xf32>
    %107 = vector.broadcast %106 : vector<1x1xf32> to vector<1x11xf32>
    %108 = arith.subf %105, %107 : vector<1x11xf32>
    %109 = math.exp %108 : vector<1x11xf32>
    %110 = arith.mulf %109, %108 : vector<1x11xf32>
    %cst_41 = arith.constant dense<0.000000e+00> : vector<1xf32>
    %111 = vector.multi_reduction <add>, %110, %cst_41 [1] : vector<1x11xf32> to vector<1xf32>
    %112 = vector.shape_cast %111 : vector<1xf32> to vector<1x1xf32>
    %cst_42 = arith.constant 0.000000e+00 : f32
    %113 = vector.broadcast %cst_42 : f32 to vector<1x1xf32>
    %114 = arith.subf %113, %112 : vector<1x1xf32>
    %115 = math.log %25 : vector<1x11xf32>
    %cst_43 = arith.constant 0.000000e+00 : f32
    %116 = vector.broadcast %cst_43 : f32 to vector<1x11xf32>
    %117 = arith.subf %116, %115 : vector<1x11xf32>
    %118 = math.log %117 : vector<1x11xf32>
    %cst_44 = arith.constant 0.000000e+00 : f32
    %119 = vector.broadcast %cst_44 : f32 to vector<1x11xf32>
    %120 = arith.subf %119, %118 : vector<1x11xf32>
    %121 = arith.addf %108, %120 : vector<1x11xf32>
    %cst_45 = arith.constant dense<0xFF800000> : vector<1xf32>
    %122 = vector.multi_reduction <maximumf>, %121, %cst_45 [1] : vector<1x11xf32> to vector<1xf32>
    %123 = vector.shape_cast %122 : vector<1xf32> to vector<1x1xf32>
    %124 = vector.broadcast %123 : vector<1x1xf32> to vector<1x11xf32>
    %125 = arith.cmpf oge, %121, %124 : vector<1x11xf32>
    %126 = arith.sitofp %31 : vector<1x11xi32> to vector<1x11xf32>
    %cst_46 = arith.constant 1.000000e+09 : f32
    %127 = vector.broadcast %cst_46 : f32 to vector<1x11xf32>
    %128 = arith.select %125, %126, %127 : vector<1x11xi1>, vector<1x11xf32>
    %cst_47 = arith.constant dense<0x7F800000> : vector<1xf32>
    %129 = vector.multi_reduction <minimumf>, %128, %cst_47 [1] : vector<1x11xf32> to vector<1xf32>
    %130 = vector.shape_cast %129 : vector<1xf32> to vector<1x1xf32>
    %131 = arith.fptosi %130 : vector<1x1xf32> to vector<1x1xi32>
    %132 = vector.broadcast %131 : vector<1x1xi32> to vector<1x11xi32>
    %133 = arith.cmpi eq, %31, %132 : vector<1x11xi32>
    %cst_48 = arith.constant 0.000000e+00 : f32
    %134 = vector.broadcast %cst_48 : f32 to vector<1x11xf32>
    %135 = arith.select %133, %108, %134 : vector<1x11xi1>, vector<1x11xf32>
    %cst_49 = arith.constant dense<0.000000e+00> : vector<1xf32>
    %136 = vector.multi_reduction <add>, %135, %cst_49 [1] : vector<1x11xf32> to vector<1xf32>
    %137 = vector.shape_cast %136 : vector<1xf32> to vector<1x1xf32>
    %138 = tpu.iota {dimensions = array<i32: 1>} : vector<1x128xi32>
    %c0_i32 = arith.constant 0 : i32
    %139 = vector.broadcast %c0_i32 : i32 to vector<1x128xi32>
    %140 = arith.cmpi eq, %138, %139 : vector<1x128xi32>
    %c1_i32 = arith.constant 1 : i32
    %141 = vector.broadcast %c1_i32 : i32 to vector<1x128xi32>
    %142 = arith.cmpi eq, %138, %141 : vector<1x128xi32>
    %c2_i32 = arith.constant 2 : i32
    %143 = vector.broadcast %c2_i32 : i32 to vector<1x128xi32>
    %144 = arith.cmpi eq, %138, %143 : vector<1x128xi32>
    %c3_i32 = arith.constant 3 : i32
    %145 = vector.broadcast %c3_i32 : i32 to vector<1x128xi32>
    %146 = arith.cmpi eq, %138, %145 : vector<1x128xi32>
    %c4_i32 = arith.constant 4 : i32
    %147 = vector.broadcast %c4_i32 : i32 to vector<1x128xi32>
    %148 = arith.cmpi eq, %138, %147 : vector<1x128xi32>
    %149 = arith.addf %50, %114 : vector<1x1xf32>
    %cst_50 = arith.constant 0.000000e+00 : f32
    %150 = vector.shape_cast %149 : vector<1x1xf32> to vector<1x1xf32>
    %151 = vector.broadcast %150 : vector<1x1xf32> to vector<1x128xf32>
    %152 = vector.broadcast %cst_50 : f32 to vector<1x128xf32>
    %153 = arith.select %148, %151, %152 : vector<1x128xi1>, vector<1x128xf32>
    %154 = vector.shape_cast %137 : vector<1x1xf32> to vector<1x1xf32>
    %155 = vector.broadcast %154 : vector<1x1xf32> to vector<1x128xf32>
    %156 = arith.select %146, %155, %153 : vector<1x128xi1>, vector<1x128xf32>
    %157 = vector.shape_cast %73 : vector<1x1xf32> to vector<1x1xf32>
    %158 = vector.broadcast %157 : vector<1x1xf32> to vector<1x128xf32>
    %159 = arith.select %144, %158, %156 : vector<1x128xi1>, vector<1x128xf32>
    %160 = vector.shape_cast %130 : vector<1x1xf32> to vector<1x1xf32>
    %161 = vector.broadcast %160 : vector<1x1xf32> to vector<1x128xf32>
    %162 = arith.select %142, %161, %159 : vector<1x128xi1>, vector<1x128xf32>
    %163 = vector.shape_cast %66 : vector<1x1xf32> to vector<1x1xf32>
    %164 = vector.broadcast %163 : vector<1x1xf32> to vector<1x128xf32>
    %165 = arith.select %140, %164, %162 : vector<1x128xi1>, vector<1x128xf32>
    %c0_51 = arith.constant 0 : index
    %c0_52 = arith.constant 0 : index
    %c0_53 = arith.constant 0 : index
    %166 = vector.load %arg6[%c0_51, %c0_52, %c0_53] : memref<1x1x128xf32, #tpu.memory_space<vmem>>, vector<1x1x128xf32>
    %167 = vector.shape_cast %166 : vector<1x1x128xf32> to vector<1x128xf32>
    %168 = vector.shape_cast %165 : vector<1x128xf32> to vector<1x1x128xf32>
    tpu.vector_store %arg6[%c0_51, %c0_52, %c0_53], %168 {strides = array<i32>} : memref<1x1x128xf32, #tpu.memory_space<vmem>>, vector<1x1x128xf32>,
    return
  }
  func.func @transform_0(%arg0: i32) -> (i32, i32, i32) {
    %c0_i32 = arith.constant 0 : i32
    %c0_i32_0 = arith.constant 0 : i32
    %c0_i32_1 = arith.constant 0 : i32
    return %arg0, %c0_i32, %c0_i32_0 : i32, i32, i32
  }
  func.func @transform_1(%arg0: i32) -> (i32, i32, i32) {
    %c0_i32 = arith.constant 0 : i32
    %c0_i32_0 = arith.constant 0 : i32
    %c0_i32_1 = arith.constant 0 : i32
    return %arg0, %c0_i32, %c0_i32_0 : i32, i32, i32
  }
  func.func @transform_2(%arg0: i32) -> (i32, i32, i32) {
    %c0_i32 = arith.constant 0 : i32
    %c0_i32_0 = arith.constant 0 : i32
    %c0_i32_1 = arith.constant 0 : i32
    return %arg0, %c0_i32, %c0_i32_0 : i32, i32, i32
  }
  func.func @transform_3(%arg0: i32) -> (i32, i32) {
    %c0_i32 = arith.constant 0 : i32
    %c0_i32_0 = arith.constant 0 : i32
    %c0_i32_1 = arith.constant 0 : i32
    return %c0_i32, %c0_i32_0 : i32, i32
  }
  func.func @transform_4(%arg0: i32) -> (i32, i32) {
    %c0_i32 = arith.constant 0 : i32
    %c0_i32_0 = arith.constant 0 : i32
    %c0_i32_1 = arith.constant 0 : i32
    return %c0_i32, %c0_i32_0 : i32, i32
  }
  func.func @transform_5(%arg0: i32) -> (i32, i32, i32) {
    %c0_i32 = arith.constant 0 : i32
    %c0_i32_0 = arith.constant 0 : i32
    %c0_i32_1 = arith.constant 0 : i32
    return %arg0, %c0_i32, %c0_i32_0 : i32, i32, i32
  }
}

</mosaic_0001>

<bundles_post_ra>
// kernel: actor_forward.1
= control target key start
LH: loop header
LB: loop body
LE: loop exit
PB: predicated region body
PF: predicated region fallthrough
CT: control target
= control target key end

     0   :  { %s807_s18 = smov 0   ;;  %s923_s0 = inlined_call_operand.vmem [shape: f32[2,9,64], index: 0, kind: input, shape index: {}]   ;;  %s924_s1 = inlined_call_operand.vmem [shape: bf16[2,64,11], index: 1, kind: input, shape index: {}]   ;;  %s925_s2 = inlined_call_operand.vmem [shape: f32[2,4,128], index: 2, kind: input, shape index: {}]   ;;  %s926_s3 = inlined_call_operand.vmem [shape: bf16[128,64], index: 3, kind: input, shape index: {}]   ;;  %s927_s4 = inlined_call_operand.vmem [shape: f32[3,64], index: 4, kind: input, shape index: {}]   ;;  %s928_s5 = inlined_call_operand.vmem [shape: f32[2,1,128], index: 5, kind: output, shape index: {}]  }
   0x1 LB: > { %s647_s19 = sadd.s32 4294967295, %s774_s18   ;;  %p651_p0 = scmp.ge.s32.totalorder %s774_s18, 1  ;;  %s774_s18 = sphi %s807_s18, %s15_s18  }
   0x2   : > { %p206_p1 = scmp.lt.s32.totalorder %s774_s18, 3 }
   0x4   : > { %p207_p2 = pnand %p651_p0, %p206_p1 }
   0x5   : > { %p241_p3 = scmp.lt.s32.totalorder (!%p207_p2), %s647_s19, 1 }
   0x6   : > { %210 = sbr.rel (%p207_p2) target bundleno = 1732 (0x6c4), region = 40 }
   0xb   : > { %v718_v0 = vld [vmem:[%s926_s3 + $0x18] sm:$0xff]  ;;  %v717_v1 = vld [vmem:[%s926_s3 + $0x10] sm:$0xff]  ;;  %s930_s19 = smov (!%p241_p3, %s647_s19), 1  ;;  %v716_v2 = vld [vmem:[%s926_s3 + $0x8] sm:$0xff]  ;;  %vm303_vm0 = vcmask 523264   ;;  %vm409_vm1 = vcmask 65536   ;;  %v377_v52 = vlaneseq }
   0xc   : > { %311 = vmatpush.bf16.msra.mxu0 %v718_v0  ;;  %s713_s24 = sshll.u32 %s930_s19, 4  ;;  %v715_v3 = vld [vmem:[%s926_s3] sm:$0xff]  ;;  %v722_v7 = vld [vmem:[%s926_s3 + $0x38] sm:$0xff]  ;;  %v721_v8 = vld [vmem:[%s926_s3 + $0x30] sm:$0xff]  ;;  %s656_s17 = sshll.u32 %s930_s19, 2  ;;  %vm464_vm4 = vcmask 516096  }
   0xd   : > { %s245_s29 = scalar_lea.vmem %s923_s0, %s713_s24  ;;  %359 = vmatpush.bf16.msra.mxu1 %v722_v7  ;;  %v720_v9 = vld [vmem:[%s926_s3 + $0x28] sm:$0xff]  ;;  %v719_v10 = vld [vmem:[%s926_s3 + $0x20] sm:$0xff]  ;;  %s863_s22 = scalar_lea.vmem %s925_s2, %s656_s17  ;;  %v873_v53 = vand.u32 127, %v377_v52  ;;  %v456_v62 = vshrl.u32 %v377_v52, 7  ;;  %vm523_vm9 = vcmask 81920  }
   0xe   : > { %v259_v4 = vld [vmem:[%s245_s29] sm:$0xff]  ;;  %v260_v5 = vld [vmem:[%s245_s29 + $0x8] sm:$0x1]  ;;  %s714_s23 = sshll.u32 %s930_s19, 5  ;;  %s257_s29 = scalar_lea.vmem %s928_s5, %s930_s19 }
   0xf   : > { %v261_v6 = vpack.c.bf16 %v260_v5, %v259_v4  ;;  %v278_v11 = vld [vmem:[%s927_s4] sm:$0x7]  ;;  %v440_v54 = vcvt.s32.f32 %v873_v53  ;;  %s250_s26 = scalar_lea.vmem %s924_s1, %s714_s23  ;;  %vm451_vm8 = vcmp.eq.s32.totalorder %v873_v53, 10  ;;  %vm568_vm14 = vcmp.eq.s32.totalorder %v873_v53, 4 }
  0x10   : > { %312 = vmatpush.bf16.msra.mxu0 %v717_v1  ;;  %v321_v13 = vperm.slane %v278_v11, 0  ;;  %v327_v21 = vperm.slane %v278_v11, 1  ;;  %v380_v29 = vrot.slane %v278_v11, 2  ;;  %v375_v30 = vld [vmem:[%s863_s22 + $0x2] sm:$0x1]  ;;  %v726_v58 = vld [vmem:[%s250_s26 + $0x18] sm:$0xff] }
  0x11   : > { %360 = vmatpush.bf16.msra.mxu1 %v721_v8  ;;  %v373_v39 = vld [vmem:[%s863_s22] sm:$0x1]  ;;  %514 = vmatpush.bf16.msra.mxu3 %v726_v58  ;;  %v725_v59 = vld [vmem:[%s250_s26 + $0x10] sm:$0xff]  ;;  %v724_v60 = vld [vmem:[%s250_s26 + $0x8] sm:$0xff]  ;;  %vm567_vm15 = vcmp.eq.s32.totalorder %v873_v53, 3 }
  0x12   : > { %v723_v61 = vld [vmem:[%s250_s26] sm:$0xff] }
  0x14   : > { %313 = vmatpush.bf16.msra.mxu0 %v716_v2 }
  0x15   : > { %361 = vmatpush.bf16.msra.mxu1 %v720_v9  ;;  %515 = vmatpush.bf16.msra.mxu3 %v725_v59 }
  0x18   : > { %314 = vmatpush.bf16.msra.mxu0 %v715_v3  ;;  %v457_v3 = vadd.s32 8, %v456_v62 }
  0x19   : > { %362 = vmatpush.bf16.msra.mxu1 %v719_v10  ;;  %516 = vmatpush.bf16.msra.mxu3 %v724_v60 }
  0x1b   : > { %673 = vmatmul.msk.bf16.vlgmr.msra.gmra.mxu0 %vm303_vm0, %v261_v6 }
  0x1d   : > { %517 = vmatpush.bf16.msra.mxu3 %v723_v61 }
  0x98   : > { %v849_v12 = vpop.f32.mrf.mxu0 }
  0x99   : > { %v322_v14 = vadd.f32 %v321_v13, %v849_v12 }
  0x9b   : > { %v324_v17 = vmax.f32 %v322_v14, 0.0 }
  0xa0   : > { %v852_v15 = vpop.f32.mrf.mxu0 }
  0xa1   : > { %v323_v16 = vadd.f32 %v321_v13, %v852_v15 }
  0xa3   : > { %v325_v18 = vmax.f32 %v323_v16, 0.0 }
  0xa5   : > { %v326_v19 = vpack.c.bf16 %v325_v18, %v324_v17 }
  0xa7   : > { %690 = vmatmul.msk.bf16.vlgmr.msra.gmra.mxu1 %vm303_vm0, %v326_v19 }
 0x124   : > { %v364_v20 = vpop.f32.mrf.mxu1 }
 0x125   : > { %v365_v23 = vadd.f32 %v364_v20, %v327_v21 }
 0x127   : > { %v369_v26 = vadd.f32 %v365_v23, %v259_v4 }
 0x129   : > { %v371_v28 = vmax.f32 %v369_v26, 0.0 }
 0x12c   : > { %v366_v22 = vpop.f32.mrf.mxu1 }
 0x12d   : > { %v367_v24 = vadd.f32 %v366_v22, %v327_v21 }
 0x12f   : > { %v370_v25 = vadd.f32 %v367_v24, %v260_v5 }
 0x131   : > { %v372_v27 = vmax.f32 %v370_v25, 0.0 }
 0x133   : > { %691 = vmatpush.xpose.msk.msra.mxu2 %vm303_vm0, %v372_v27 }
 0x137   : > { %692 = vmatpush.xpose.msk.msra.mxu2 %vm303_vm0, %v371_v28 }
 0x13a   : > { %693 = vmatmul.msk.f32.vlgmr.msra.gmra.mxu2 %vm303_vm0, %v380_v29 }
 0x1bd   : > { %v406_v31 = vpop.f32.mrf.mxu2 }
 0x1be   : > { %v407_v32 = vadd.f32 %v406_v31, %v375_v30 }
 0x1c0   : > { %v410_v33 = vsel %vm409_vm1, %v407_v32, -inf }
 0x1c1   : > { %411 = vmax.xlane.f32.xlu0 %v410_v33 }
 0x234   : > { %v412_v34 = vpop.xlane.xlu0 %411 }
 0x235   : > { %v413_v35 = vsub.f32 %v407_v32, %v412_v34 }
 0x237   : > { %v414_v36 = vmul.f32 1.442695, %v413_v35 }
 0x239   : > { %746 = vpow2.f32 %v414_v36 }
 0x23a   : > { %748 = vlog2.f32 %v373_v39 }
 0x23f   : > { %v747_v37 = vpop.eup %746 }
 0x240   : > { %v416_v38 = vsel %vm409_vm1, %v747_v37, 0.0  ;;  %v749_v40 = vpop.eup %748 }
 0x241   : > { %417 = vadd.xlane.f32.xlu0 %v416_v38  ;;  %v430_v41 = vmul.f32 0.6931472, %v749_v40  ;;  %v374_v38 = vld [vmem:[%s863_s22 + $0x1] sm:$0x1] }
 0x243   : > { %v431_v42 = vsub.f32 0.0, %v430_v41 }
 0x245   : > { %750 = vlog2.f32 %v431_v42 }
 0x24b   : > { %v751_v44 = vpop.eup %750 }
 0x24c   : > { %v433_v45 = vmul.f32 0.6931472, %v751_v44 }
 0x24e   : > { %v434_v48 = vsub.f32 0.0, %v433_v45 }
 0x2b4   : > { %v418_v43 = vpop.xlane.xlu0 %417 }
 0x2b5   : > { %752 = vlog2.f32 %v418_v43 }
 0x2bb   : > { %v753_v46 = vpop.eup %752 }
 0x2bc   : > { %v420_v47 = vmul.f32 0.6931472, %v753_v46 }
 0x2be   : > { %v869_v49 = vsub.f32 %v413_v35, %v420_v47 }
 0x2c0   : > { %v435_v50 = vadd.f32 %v434_v48, %v869_v49  ;;  %v422_v30 = vmul.f32 1.442695, %v869_v49 }
 0x2c2   : > { %v436_v51 = vsel %vm409_vm1, %v435_v50, -inf }
 0x2c3   : > { %437 = vmax.xlane.f32.xlu1 %v436_v51 }
 0x336   : > { %v438_v55 = vpop.xlane.xlu1 %437 }
 0x337   : > { %vm439_vm2 = vcmp.ge.f32.partialorder %v435_v50, %v438_v55 }
 0x338   : > { %v441_v56 = vsel %vm439_vm2, %v440_v54, 1e+09  ;;  %vm564_vm2 = vcmp.eq.s32.totalorder %v873_v53, 0 }
 0x339   : > { %v442_v57 = vsel %vm409_vm1, %v441_v56, inf }
 0x33a   : > { %443 = vmin.xlane.f32.xlu1 %v442_v57 }
 0x3ad   : > { %v883_v63 = vpop.xlane.xlu1 %443 }
 0x3ae   : > { %vm727_vm3 = vcmp.lt.s32.totalorder %v883_v63, 0  ;;  %v728_v0 = vceil.f32 %v883_v63  ;;  %v729_v1 = vfloor.f32 %v883_v63 }
 0x3b0   : > { %v730_v2 = vsel %vm727_vm3, %v728_v0, %v729_v1 }
 0x3b1   : > { %v731_v4 = vcvt.f32.s32 %v730_v2 }
 0x3b3   : > { %v458_v5 = vperm.slane %v731_v4, 0  ;;  %vm452_vm7 = vcmp.eq.s32.totalorder %v731_v4, 8  ;;  %vm446_vm10 = vcmp.eq.s32.totalorder %v873_v53, %v731_v4 }
 0x3b4   : > { %v447_v36 = vsel %vm446_vm10, %v869_v49, 0.0 }
 0x3b5   : > { %vm459_vm5 = vcmp.eq.s32.totalorder %v456_v62, %v458_v5  ;;  %vm460_vm6 = vcmp.eq.s32.totalorder %v457_v3, %v458_v5  ;;  %v448_v37 = vsel %vm409_vm1, %v447_v36, 0.0 }
 0x3b6   : > { %v461_v6 = vsel %vm459_vm5, %v849_v12, 0.0  ;;  %v462_v7 = vsel %vm460_vm6, %v852_v15, 0.0  ;;  %v376_v12 = vld [vmem:[%s863_s22 + $0x3] sm:$0x1]  ;;  %v776_v15 = vmov 0.0  }
 0x3b7   : > { %v463_v8 = vsel %vm303_vm0, %v461_v6, 0.0  ;;  %v465_v9 = vsel %vm464_vm4, %v462_v7, 0.0  ;;  %v453_v21 = vsel %vm452_vm7, -1e+30, %v776_v15 }
 0x3b8   : > { %v466_v10 = vadd.f32 %v465_v9, %v463_v8  ;;  %v454_v22 = vsel %vm451_vm8, %v453_v21, %v376_v12 }
 0x3ba   : > { %v467_v11 = vrot.slane %v466_v10, 4 }
 0x3bc   : > { %v468_v13 = vadd.f32 %v467_v11, %v466_v10 }
 0x3be   : > { %v469_v14 = vrot.slane %v468_v13, 2 }
 0x3c0   : > { %v470_v16 = vadd.f32 %v469_v14, %v468_v13 }
 0x3c2   : > { %v471_v17 = vrot.slane %v470_v16, 1 }
 0x3c4   : > { %v472_v18 = vadd.f32 %v471_v17, %v470_v16 }
 0x3c6   : > { %754 = vtanh.f32 %v472_v18 }
 0x3cc   : > { %v755_v19 = vpop.eup %754 }
 0x3cd   : > { %v474_v20 = vpack.c.bf16 %v755_v19, %v755_v19 }
 0x3cf   : > { %710 = vmatmul.msk.bf16.vlgmr.msra.gmra.mxu3 %vm303_vm0, %v474_v20  ;;  %vm566_vm0 = vcmp.eq.s32.totalorder %v873_v53, 2 }
 0x452   : > { %v519_v23 = vpop.f32.mrf.mxu3 }
 0x453   : > { %v520_v24 = vadd.f32 %v519_v23, %v454_v22 }
 0x455   : > { %v524_v25 = vsel %vm523_vm9, %v520_v24, -inf }
 0x456   : > { %525 = vmax.xlane.f32.xlu2 %v524_v25 }
 0x45a   : > { %v521_v26 = vpop.f32.mrf.mxu3 }
 0x4c9   : > { %v526_v27 = vpop.xlane.xlu2 %525 }
 0x4ca   : > { %v527_v28 = vsub.f32 %v520_v24, %v526_v27 }
 0x4cc   : > { %v528_v29 = vmul.f32 1.442695, %v527_v28 }
 0x4ce   : > { %756 = vpow2.f32 %v528_v29 }
 0x4cf   : > { %758 = vpow2.f32 %v422_v30 }
 0x4d0   : > { %760 = vlog2.f32 %v374_v38 }
 0x4d4   : > { %v757_v31 = vpop.eup %756 }
 0x4d5   : > { %v530_v32 = vsel %vm523_vm9, %v757_v31, 0.0  ;;  %v759_v33 = vpop.eup %758 }
 0x4d6   : > { %531 = vadd.xlane.f32.xlu2 %v530_v32  ;;  %v424_v34 = vmul.f32 %v759_v33, %v869_v49  ;;  %v761_v39 = vpop.eup %760 }
 0x4d7   : > { %v544_v40 = vmul.f32 0.6931472, %v761_v39 }
 0x4d8   : > { %v425_v35 = vsel %vm409_vm1, %v424_v34, 0.0  ;;  %vm565_vm1 = vcmp.eq.s32.totalorder %v873_v53, 1 }
 0x4d9   : > { %v545_v41 = vsub.f32 0.0, %v544_v40 }
 0x4db   : > { %762 = vlog2.f32 %v545_v41 }
 0x4de   : > { %426 = vadd.xlane.f32.xlu2 %v425_v35 }
 0x4e1   : > { %v763_v43 = vpop.eup %762 }
 0x4e2   : > { %v547_v44 = vmul.f32 0.6931472, %v763_v43 }
 0x4e4   : > { %v548_v47 = vsub.f32 0.0, %v547_v44 }
 0x4e6   : > { %449 = vadd.xlane.f32.xlu2 %v448_v37 }
 0x549   : > { %v532_v42 = vpop.xlane.xlu2 %531 }
 0x54a   : > { %764 = vlog2.f32 %v532_v42 }
 0x550   : > { %v765_v45 = vpop.eup %764 }
 0x551   : > { %v534_v46 = vmul.f32 0.6931472, %v765_v45  ;;  %v427_v5 = vpop.xlane.xlu2 %426 }
 0x553   : > { %v535_v48 = vsub.f32 %v527_v28, %v534_v46 }
 0x555   : > { %v549_v50 = vadd.f32 %v548_v47, %v535_v48  ;;  %v536_v51 = vmul.f32 1.442695, %v535_v48 }
 0x557   : > { %v550_v49 = vsel %vm523_vm9, %v549_v50, -inf  ;;  %766 = vpow2.f32 %v536_v51 }
 0x558   : > { %551 = vmax.xlane.f32.xlu0 %v550_v49 }
 0x559   : > { %v450_v10 = vpop.xlane.xlu2 %449 }
 0x55d   : > { %v767_v52 = vpop.eup %766 }
 0x55e   : > { %v538_v55 = vmul.f32 %v767_v52, %v535_v48 }
 0x560   : > { %v539_v56 = vsel %vm523_vm9, %v538_v55, 0.0 }
 0x561   : > { %540 = vadd.xlane.f32.xlu0 %v539_v56 }
 0x5cb   : > { %v552_v57 = vpop.xlane.xlu0 %551 }
 0x5cc   : > { %vm553_vm11 = vcmp.ge.f32.partialorder %v549_v50, %v552_v57 }
 0x5cd   : > { %v554_v58 = vsel %vm553_vm11, %v440_v54, 1e+09  ;;  %v428_v54 = vsub.f32 0.0, %v427_v5 }
 0x5ce   : > { %v555_v59 = vsel %vm523_vm9, %v554_v58, inf }
 0x5cf   : > { %556 = vmin.xlane.f32.xlu1 %v555_v59 }
 0x5d4   : > { %v541_v4 = vpop.xlane.xlu0 %540 }
 0x5d5   : > { %v542_v6 = vsub.f32 0.0, %v541_v4 }
 0x5d7   : > { %v569_v7 = vadd.f32 %v542_v6, %v428_v54 }
 0x5d9   : > { %v570_v8 = vsel %vm568_vm14, %v569_v7, 0.0 }
 0x642   : > { %v557_v60 = vpop.xlane.xlu1 %556 }
 0x643   : > { %vm732_vm12 = vcmp.lt.s32.totalorder %v557_v60, 0  ;;  %v733_v61 = vceil.f32 %v557_v60  ;;  %v734_v62 = vfloor.f32 %v557_v60 }
 0x645   : > { %v735_v0 = vsel %vm732_vm12, %v733_v61, %v734_v62 }
 0x646   : > { %v736_v1 = vcvt.f32.s32 %v735_v0 }
 0x648   : > { %vm559_vm13 = vcmp.eq.s32.totalorder %v873_v53, %v736_v1 }
 0x649   : > { %v560_v2 = vsel %vm559_vm13, %v535_v48, 0.0 }
 0x64a   : > { %v561_v3 = vsel %vm523_vm9, %v560_v2, 0.0 }
 0x64b   : > { %562 = vadd.xlane.f32.xlu1 %v561_v3 }
 0x6be   : > { %v563_v9 = vpop.xlane.xlu1 %562 }
 0x6bf   : > { %v571_v11 = vsel %vm567_vm15, %v563_v9, %v570_v8 }
 0x6c0   : > { %v572_v13 = vsel %vm566_vm0, %v450_v10, %v571_v11 }
 0x6c1   : > { %v573_v14 = vsel %vm565_vm1, %v557_v60, %v572_v13 }
 0x6c2   : > { %v574_v16 = vsel %vm564_vm2, %v883_v63, %v573_v14 }
 0x6c3   : > { %575 = vst [vmem:[%s257_s29] sm:$0x1] %v574_v16 }
 0x6c4 PF: > { %s15_s18 = sadd.s32 1, %s774_s18  }
 0x6c5   : > { %p12_p4 = scmp.ge.s32.totalorder %s15_s18, 4  }
 0x6c7   :  { %14 = sbr.rel (!%p12_p4) target bundleno = 1 (0x1), region = 76 }

</bundles_post_ra>
